<compile_context>
chip_gen: v5e
topology: v5e:2x2
jax: 0.10.0
libtpu: 0.0.40
codegen_flags: <defaults>
</compile_context>

<pallas_src>
import functools
import math

import jax
import jax.numpy as jnp
from jax import lax
from jax.experimental import pallas as pl
from jax.experimental.pallas import tpu as pltpu


# ----------------------- per-generation tiling / VMEM -----------------------

def _detect_vmem_bytes():
    try:
        return int(pltpu.get_tpu_info().vmem_capacity_bytes)
    except Exception:
        return 64 * 1024 * 1024          # conservative (v7x-sized) fallback


_VMEM_BYTES = _detect_vmem_bytes()
# Raise the scoped-VMEM limit (defaults: 16 MiB on v5e, 32 MiB on v6e/v7x) so
# the larger, more HBM-efficient tiles below stay admissible.
_VMEM_LIMIT = int(min(_VMEM_BYTES * 3 // 4, 96 * 1024 * 1024))

if _VMEM_BYTES >= 100 * 1024 * 1024:      # v5e / v6e: 128 MiB physical VMEM
    _ROW_TILES = (512, 256, 128, 64, 32, 16, 8)     # sublane axis candidates
    _LANE_TILES = (1024, 512, 256, 128)             # lane axis candidates
else:                                     # v7x: 64 MiB per TensorCore
    _ROW_TILES = (256, 128, 64, 32, 16, 8)
    _LANE_TILES = (512, 256, 128)


def _cparams(dims):
    return pltpu.CompilerParams(dimension_semantics=dims,
                                vmem_limit_bytes=_VMEM_LIMIT)


def _pick_tile(dim, candidates):
    """Largest candidate that evenly divides `dim`, else the full dim.

    Full-dim blocks always satisfy the TPU (8, 128) block constraint; even
    divisors avoid garbage contributions from padded K-reduction blocks.
    TODO(synk): replace the full-dim fallback with pl.cdiv grids + masking so
    awkward shapes keep bounded tile sizes on v7x.
    """
    for c in candidates:
        if c <= dim and dim % c == 0:
            return c
    return dim


def _heads_per_block(num_heads, head_dim):
    """Smallest head group whose packed width is lane-dense (multiple of 128).

    Falls back to all heads (block width == E == full array width), which also
    satisfies the block-shape constraint.
    """
    for hb in range(1, num_heads + 1):
        if num_heads % hb == 0 and (hb * head_dim) % 128 == 0:
            return hb
    return num_heads


# ----------------------------- QKV projection -----------------------------

def _qkv_proj_kernel(x_ref, wq_ref, wk_ref, wv_ref, bq_ref, bk_ref, bv_ref,
                     q_ref, k_ref, v_ref, accq, acck, accv, *, mxu_dtype):
    kk = pl.program_id(2)

    @pl.when(kk == 0)
    def _():
        accq[...] = jnp.zeros_like(accq)
        acck[...] = jnp.zeros_like(acck)
        accv[...] = jnp.zeros_like(accv)

    x = x_ref[...].astype(mxu_dtype)
    accq[...] += jnp.dot(x, wq_ref[...].astype(mxu_dtype),
                         preferred_element_type=jnp.float32)
    acck[...] += jnp.dot(x, wk_ref[...].astype(mxu_dtype),
                         preferred_element_type=jnp.float32)
    accv[...] += jnp.dot(x, wv_ref[...].astype(mxu_dtype),
                         preferred_element_type=jnp.float32)

    @pl.when(kk == pl.num_programs(2) - 1)
    def _():
        q_ref[...] = (accq[...] + bq_ref[...]).astype(q_ref.dtype)
        k_ref[...] = (acck[...] + bk_ref[...]).astype(k_ref.dtype)
        v_ref[...] = (accv[...] + bv_ref[...]).astype(v_ref.dtype)


def qkv_proj(x, wq_t, wk_t, wv_t, bq, bk, bv, *, mxu_dtype):
    """x: (M, K); returns q, k, v each (M, E) in mxu_dtype (bf16 by default)."""
    M, K = x.shape
    E = wq_t.shape[1]
    tm = _pick_tile(M, _ROW_TILES)
    tn = _pick_tile(E, _LANE_TILES)    # tile the output axis (v7x VMEM bound)
    tk = _pick_tile(K, _LANE_TILES)
    grid = (M // tm, E // tn, K // tk)

    x_spec = pl.BlockSpec((tm, tk), lambda i, j, k: (i, k))
    w_specs = [pl.BlockSpec((tk, tn), lambda i, j, k: (k, j)) for _ in range(3)]
    b_specs = [pl.BlockSpec((1, tn), lambda i, j, k: (0, j)) for _ in range(3)]
    o_specs = [pl.BlockSpec((tm, tn), lambda i, j, k: (i, j)) for _ in range(3)]

    q, k, v = pl.pallas_call(
        functools.partial(_qkv_proj_kernel, mxu_dtype=mxu_dtype),
        out_shape=[jax.ShapeDtypeStruct((M, E), mxu_dtype) for _ in range(3)],
        grid=grid,
        in_specs=[x_spec] + w_specs + b_specs,
        out_specs=o_specs,
        scratch_shapes=[pltpu.VMEM((tm, tn), jnp.float32) for _ in range(3)],
        compiler_params=_cparams(("parallel", "parallel", "arbitrary")),
    )(x, wq_t, wk_t, wv_t, bq, bk, bv)
    return q, k, v


# ------------------ attention + out_proj + residual + LN1 ------------------

def _mha_outproj_ln_kernel(q_ref, k_ref, v_ref, wo_ref, bo_ref, r_ref, g_ref,
                           beta_ref, o_ref, acc_ref, *, scale, heads_per_block,
                           head_dim, eps, mxu_dtype):
    gi = pl.program_id(1)

    @pl.when(gi == 0)
    def _():
        acc_ref[...] = jnp.zeros_like(acc_ref)

    def head_attn(q, k, v):
        # QK^T without an explicit transpose: contract the head_dim axis.
        s = lax.dot_general(q, k, (((1,), (1,)), ((), ())),
                            preferred_element_type=jnp.float32) * scale
        m = jnp.max(s, axis=-1, keepdims=True)
        p = jnp.exp(s - m)
        p = p * pl.reciprocal(jnp.sum(p, axis=-1, keepdims=True), approx=True)
        return jnp.dot(p.astype(mxu_dtype), v, preferred_element_type=jnp.float32)

    if heads_per_block == 1:
        # Realistic case (head_dim multiple of 128): full-block, slice-free.
        attn = head_attn(q_ref[...].astype(mxu_dtype),
                         k_ref[...].astype(mxu_dtype),
                         v_ref[...].astype(mxu_dtype))
    else:
        # Small-head-dim fallback: per-head attention inside the block, one
        # lane concat, then a single wide out_proj matmul (better MXU fill than
        # per-head (L, Dh) @ (Dh, E) products).
        # TODO(synk): batched-over-heads dot_general to avoid in-register lane
        # slices / concat for sub-128 head dims.
        outs = []
        for h in range(heads_per_block):
            lo, hi = h * head_dim, (h + 1) * head_dim
            outs.append(head_attn(q_ref[:, lo:hi].astype(mxu_dtype),
                                  k_ref[:, lo:hi].astype(mxu_dtype),
                                  v_ref[:, lo:hi].astype(mxu_dtype)))
        attn = jnp.concatenate(outs, axis=-1)

    # out_proj contribution of this head group; head-group axis is the
    # ("arbitrary") reduction, so the attention tensor never touches HBM.
    acc_ref[...] += jnp.dot(attn.astype(mxu_dtype), wo_ref[...].astype(mxu_dtype),
                            preferred_element_type=jnp.float32)

    @pl.when(gi == pl.num_programs(1) - 1)
    def _():
        y = acc_ref[...] + bo_ref[...] + r_ref[...].astype(jnp.float32)
        mean = jnp.mean(y, axis=-1, keepdims=True)
        c = y - mean
        var = jnp.mean(c * c, axis=-1, keepdims=True)      # biased var (torch LN)
        o_ref[...] = (c * lax.rsqrt(var + eps) * g_ref[...]
                      + beta_ref[...]).astype(o_ref.dtype)


def mha_outproj_layernorm(q, k, v, wo_t, bo, residual, gamma, beta, *,
                          num_heads, seq_len, mxu_dtype, eps=1e-5):
    """LayerNorm(residual + MHA(q,k,v) @ Wo + bo), fully fused."""
    M, E = q.shape
    batch = M // seq_len
    head_dim = E // num_heads
    hb = _heads_per_block(num_heads, head_dim)
    n_groups = num_heads // hb
    width = hb * head_dim
    scale = 1.0 / math.sqrt(head_dim)

    assert seq_len % 8 == 0 or batch == 1, (
        "seq_len must be a multiple of 8 (TPU sublane tile) unless batch == 1")

    def qkv_spec():
        return pl.BlockSpec((seq_len, width), lambda n, g: (n, g))

    return pl.pallas_call(
        functools.partial(_mha_outproj_ln_kernel, scale=scale,
                          heads_per_block=hb, head_dim=head_dim, eps=eps,
                          mxu_dtype=mxu_dtype),
        out_shape=jax.ShapeDtypeStruct((M, E), residual.dtype),
        grid=(batch, n_groups),
        in_specs=[qkv_spec(), qkv_spec(), qkv_spec(),
                  pl.BlockSpec((width, E), lambda n, g: (g, 0)),    # Wo slice
                  pl.BlockSpec((1, E), lambda n, g: (0, 0)),        # bo
                  pl.BlockSpec((seq_len, E), lambda n, g: (n, 0)),  # residual
                  pl.BlockSpec((1, E), lambda n, g: (0, 0)),        # gamma
                  pl.BlockSpec((1, E), lambda n, g: (0, 0))],       # beta
        out_specs=pl.BlockSpec((seq_len, E), lambda n, g: (n, 0)),
        scratch_shapes=[pltpu.VMEM((seq_len, E), jnp.float32)],
        compiler_params=_cparams(("parallel", "arbitrary")),
    )(q, k, v, wo_t, bo, residual, gamma, beta)


# ------------------ fused FF1 + ReLU + FF2 + residual + LN2 ------------------

def _ffn_residual_ln_kernel(x_ref, w1_ref, b1_ref, w2_ref, b2_ref, g_ref,
                            beta_ref, o_ref, acc_ref, *, eps, mxu_dtype):
    j = pl.program_id(1)

    @pl.when(j == 0)
    def _():
        acc_ref[...] = jnp.zeros_like(acc_ref)

    # FF1 chunk (relu(x @ W1_chunk + b1_chunk)) stays in registers/VMEM and is
    # immediately consumed by the FF2 chunk: the (M, FF) intermediate never
    # round-trips HBM.
    x = x_ref[...].astype(mxu_dtype)
    h = jnp.dot(x, w1_ref[...].astype(mxu_dtype),
                preferred_element_type=jnp.float32)
    h = jnp.maximum(h + b1_ref[...], 0.0)
    acc_ref[...] += jnp.dot(h.astype(mxu_dtype), w2_ref[...].astype(mxu_dtype),
                            preferred_element_type=jnp.float32)

    @pl.when(j == pl.num_programs(1) - 1)
    def _():
        # x_ref doubles as the residual (same block, no second DMA).
        y = acc_ref[...] + b2_ref[...] + x_ref[...].astype(jnp.float32)
        mean = jnp.mean(y, axis=-1, keepdims=True)
        c = y - mean
        var = jnp.mean(c * c, axis=-1, keepdims=True)       # biased var (torch LN)
        o_ref[...] = (c * lax.rsqrt(var + eps) * g_ref[...]
                      + beta_ref[...]).astype(o_ref.dtype)


def ffn_residual_layernorm(x, w1_t, b1, w2_t, b2, gamma, beta, *,
                           mxu_dtype, eps=1e-5):
    """LayerNorm(x + relu(x @ W1 + b1) @ W2 + b2), fused into one kernel."""
    M, E = x.shape
    FF = w1_t.shape[1]
    tm = _pick_tile(M, _ROW_TILES)
    tf = _pick_tile(FF, _LANE_TILES)   # FF chunks are the reduction axis
    grid = (M // tm, FF // tf)
    return pl.pallas_call(
        functools.partial(_ffn_residual_ln_kernel, eps=eps, mxu_dtype=mxu_dtype),
        out_shape=jax.ShapeDtypeStruct((M, E), x.dtype),
        grid=grid,
        in_specs=[
            pl.BlockSpec((tm, E), lambda i, j: (i, 0)),    # x1 (input + residual)
            pl.BlockSpec((E, tf), lambda i, j: (0, j)),    # W1 chunk
            pl.BlockSpec((1, tf), lambda i, j: (0, j)),    # b1 chunk
            pl.BlockSpec((tf, E), lambda i, j: (j, 0)),    # W2 chunk
            pl.BlockSpec((1, E), lambda i, j: (0, 0)),     # b2
            pl.BlockSpec((1, E), lambda i, j: (0, 0)),     # gamma
            pl.BlockSpec((1, E), lambda i, j: (0, 0)),     # beta
        ],
        out_specs=pl.BlockSpec((tm, E), lambda i, j: (i, 0)),
        scratch_shapes=[pltpu.VMEM((tm, E), jnp.float32)],
        compiler_params=_cparams(("parallel", "arbitrary")),
    )(x, w1_t, b1, w2_t, b2, gamma, beta)


# ------------------------------- forward pass -------------------------------

def transformer_block(x, params, *, mxu_dtype=jnp.bfloat16):
    """x: (L, N, E) float32 -> (L, N, E).  Matches TransformerBlock.forward
    in eval mode (dropout = identity).

    mxu_dtype: dtype fed to the MXU matmuls (and of stored weights / q,k,v);
    accumulation and all LayerNorm/softmax/ReLU math remain float32.
    """
    L, N, E = x.shape
    H = params["num_heads"]

    # Single layout change: seq-first (torch MHA default batch_first=False) ->
    # batch-first rows so each batch element's L rows are contiguous and the
    # head split/merge is expressible purely via BlockSpec index_maps.
    # Row-wise ops (linear, LayerNorm) are permutation invariant, so the math
    # is unchanged from torch's (L*N, E) flattening.
    xb = jnp.transpose(x, (1, 0, 2)).reshape(N * L, E)

    # --- multi-head self-attention (q/k/v emitted in bf16) ---
    q, k, v = qkv_proj(xb, params["wq_t"], params["wk_t"], params["wv_t"],
                       params["bq"], params["bk"], params["bv"],
                       mxu_dtype=mxu_dtype)
    # attention + out_proj + residual + LayerNorm1, all fused (dropout = id).
    x1 = mha_outproj_layernorm(q, k, v, params["wo_t"], params["bo"], xb,
                               params["ln1_g"], params["ln1_b"],
                               num_heads=H, seq_len=L, mxu_dtype=mxu_dtype)

    # --- feed-forward + residual + LayerNorm2, fused (dropout = id) ---
    x2 = ffn_residual_layernorm(x1, params["ff1_w_t"], params["ff1_b"],
                                params["ff2_w_t"], params["ff2_b"],
                                params["ln2_g"], params["ln2_b"],
                                mxu_dtype=mxu_dtype)

    return x2.reshape(N, L, E).transpose(1, 0, 2)


def init_params(key, feature_dim, num_heads, ff_hidden_dim, *,
                param_dtype=jnp.bfloat16):
    """Weights are stored pre-transposed ((in, out) layout) in `param_dtype`
    (bf16 by default: halves weight HBM traffic and VMEM block footprint);
    biases / LayerNorm params stay float32 (added to f32 accumulators).
    torch mapping: wq_t/wk_t/wv_t = in_proj_weight.chunk(3)[i].T,
    wo_t = out_proj.weight.T, ffk_w_t = feed_forward[k].weight.T.
    Note: keep E and FF multiples of 128 at realistic sizes for lane-dense
    stores; the demo shapes below are intentionally tiny.
    """
    E, FF = feature_dim, ff_hidden_dim
    ks = jax.random.split(key, 12)
    s = 0.1

    def w(k, shape):
        return (s * jax.random.normal(k, shape, jnp.float32)).astype(param_dtype)

    def b(k, shape):
        return s * jax.random.normal(k, shape, jnp.float32)

    return {
        "num_heads": num_heads,
        # nn.MultiheadAttention in_proj (3E, E) split into q/k/v and transposed.
        "wq_t": w(ks[0], (E, E)),
        "wk_t": w(ks[1], (E, E)),
        "wv_t": w(ks[2], (E, E)),
        "bq": b(ks[3], (1, E)),
        "bk": b(ks[4], (1, E)),
        "bv": b(ks[5], (1, E)),
        # out_proj
        "wo_t": w(ks[6], (E, E)),
        "bo": b(ks[7], (1, E)),
        # feed_forward: Linear(E, FF) -> ReLU -> Linear(FF, E)
        "ff1_w_t": w(ks[8], (E, FF)),
        "ff1_b": b(ks[9], (1, FF)),
        "ff2_w_t": w(ks[10], (FF, E)),
        "ff2_b": b(ks[11], (1, E)),
        # LayerNorm params (torch default init: weight=1, bias=0)
        "ln1_g": jnp.ones((1, E), jnp.float32),
        "ln1_b": jnp.zeros((1, E), jnp.float32),
        "ln2_g": jnp.ones((1, E), jnp.float32),
        "ln2_b": jnp.zeros((1, E), jnp.float32),
    }


if __name__ == "__main__":
    # seq=8, batch=2, feature_dim=32, heads=4, ff_hidden=64
    L, N, E, H, FF = 8, 2, 32, 4, 64

    key = jax.random.PRNGKey(0)
    kx, kp = jax.random.split(key)
    x = jax.random.normal(kx, (L, N, E), jnp.float32)
    params = init_params(kp, E, H, FF)

    out = jax.block_until_ready(transformer_block(x, params))

    assert out.shape == (L, N, E), out.shape
    assert bool(jnp.isfinite(out).all())
    print("KERNEL_OK")
</pallas_src>

<mosaic_0001>
module attributes {stable_mosaic.version = 11 : i64} {
  func.func @_qkv_proj_kernel(%arg0: i32, %arg1: i32, %arg2: i32, %arg3: memref<16x32xf32, #tpu.memory_space<vmem>>, %arg4: memref<32x32xbf16, #tpu.memory_space<vmem>>, %arg5: memref<32x32xbf16, #tpu.memory_space<vmem>>, %arg6: memref<32x32xbf16, #tpu.memory_space<vmem>>, %arg7: memref<1x32xf32, #tpu.memory_space<vmem>>, %arg8: memref<1x32xf32, #tpu.memory_space<vmem>>, %arg9: memref<1x32xf32, #tpu.memory_space<vmem>>, %arg10: memref<16x32xbf16, #tpu.memory_space<vmem>>, %arg11: memref<16x32xbf16, #tpu.memory_space<vmem>>, %arg12: memref<16x32xbf16, #tpu.memory_space<vmem>>, %arg13: memref<16x32xf32, #tpu.memory_space<vmem>>, %arg14: memref<16x32xf32, #tpu.memory_space<vmem>>, %arg15: memref<16x32xf32, #tpu.memory_space<vmem>>) attributes {dimension_semantics = [#tpu.dimension_semantics<parallel>, #tpu.dimension_semantics<parallel>, #tpu.dimension_semantics<arbitrary>], iteration_bounds = array<i64: 1, 1, 1>, scalar_prefetch = 0 : i64, scratch_operands = 3 : i64, tpu.core_type = #tpu.core_type<tc>, window_params = [{transform_indices = @transform_0, window_bounds = array<i64: 16, 32>}, {transform_indices = @transform_1, window_bounds = array<i64: 32, 32>}, {transform_indices = @transform_2, window_bounds = array<i64: 32, 32>}, {transform_indices = @transform_3, window_bounds = array<i64: 32, 32>}, {transform_indices = @transform_4, window_bounds = array<i64: 1, 32>}, {transform_indices = @transform_5, window_bounds = array<i64: 1, 32>}, {transform_indices = @transform_6, window_bounds = array<i64: 1, 32>}, {transform_indices = @transform_7, window_bounds = array<i64: 16, 32>}, {transform_indices = @transform_8, window_bounds = array<i64: 16, 32>}, {transform_indices = @transform_9, window_bounds = array<i64: 16, 32>}]} {
    %c0_i32 = arith.constant 0 : i32
    %0 = arith.cmpi eq, %arg2, %c0_i32 : i32
    %1 = arith.extui %0 : i1 to i32
    %c0_i32_0 = arith.constant 0 : i32
    %2 = arith.cmpi ne, %1, %c0_i32_0 : i32
    scf.if %2 {
      %cst_24 = arith.constant 0.000000e+00 : f32
      %23 = vector.broadcast %cst_24 : f32 to vector<16x32xf32>
      %c0_25 = arith.constant 0 : index
      %c0_26 = arith.constant 0 : index
      %24 = vector.load %arg13[%c0_25, %c0_26] : memref<16x32xf32, #tpu.memory_space<vmem>>, vector<16x32xf32>
      tpu.vector_store %arg13[%c0_25, %c0_26], %23 {strides = array<i32>} : memref<16x32xf32, #tpu.memory_space<vmem>>, vector<16x32xf32>,
      %cst_27 = arith.constant 0.000000e+00 : f32
      %25 = vector.broadcast %cst_27 : f32 to vector<16x32xf32>
      %c0_28 = arith.constant 0 : index
      %c0_29 = arith.constant 0 : index
      %26 = vector.load %arg14[%c0_28, %c0_29] : memref<16x32xf32, #tpu.memory_space<vmem>>, vector<16x32xf32>
      tpu.vector_store %arg14[%c0_28, %c0_29], %25 {strides = array<i32>} : memref<16x32xf32, #tpu.memory_space<vmem>>, vector<16x32xf32>,
      %cst_30 = arith.constant 0.000000e+00 : f32
      %27 = vector.broadcast %cst_30 : f32 to vector<16x32xf32>
      %c0_31 = arith.constant 0 : index
      %c0_32 = arith.constant 0 : index
      %28 = vector.load %arg15[%c0_31, %c0_32] : memref<16x32xf32, #tpu.memory_space<vmem>>, vector<16x32xf32>
      tpu.vector_store %arg15[%c0_31, %c0_32], %27 {strides = array<i32>} : memref<16x32xf32, #tpu.memory_space<vmem>>, vector<16x32xf32>,
    } else {
    }
    %c0 = arith.constant 0 : index
    %c0_1 = arith.constant 0 : index
    %3 = vector.load %arg3[%c0, %c0_1] : memref<16x32xf32, #tpu.memory_space<vmem>>, vector<16x32xf32>
    %4 = arith.truncf %3 : vector<16x32xf32> to vector<16x32xbf16>
    %c0_2 = arith.constant 0 : index
    %c0_3 = arith.constant 0 : index
    %5 = vector.load %arg13[%c0_2, %c0_3] : memref<16x32xf32, #tpu.memory_space<vmem>>, vector<16x32xf32>
    %c0_4 = arith.constant 0 : index
    %c0_5 = arith.constant 0 : index
    %6 = vector.load %arg4[%c0_4, %c0_5] : memref<32x32xbf16, #tpu.memory_space<vmem>>, vector<32x32xbf16>
    %cst = arith.constant dense<0.000000e+00> : vector<16x32xf32>
    %7 = tpu.matmul %4, %6, %cst {dimension_numbers = #tpu.dot_dimension_numbers<[1], [0], [0], [1], [0, 0, 1, 1], [], []>} : vector<16x32xbf16>, vector<32x32xbf16>, vector<16x32xf32> -> vector<16x32xf32>
    %8 = arith.addf %5, %7 : vector<16x32xf32>
    %c0_6 = arith.constant 0 : index
    %c0_7 = arith.constant 0 : index
    %9 = vector.load %arg13[%c0_6, %c0_7] : memref<16x32xf32, #tpu.memory_space<vmem>>, vector<16x32xf32>
    tpu.vector_store %arg13[%c0_6, %c0_7], %8 {strides = array<i32>} : memref<16x32xf32, #tpu.memory_space<vmem>>, vector<16x32xf32>,
    %c0_8 = arith.constant 0 : index
    %c0_9 = arith.constant 0 : index
    %10 = vector.load %arg14[%c0_8, %c0_9] : memref<16x32xf32, #tpu.memory_space<vmem>>, vector<16x32xf32>
    %c0_10 = arith.constant 0 : index
    %c0_11 = arith.constant 0 : index
    %11 = vector.load %arg5[%c0_10, %c0_11] : memref<32x32xbf16, #tpu.memory_space<vmem>>, vector<32x32xbf16>
    %cst_12 = arith.constant dense<0.000000e+00> : vector<16x32xf32>
    %12 = tpu.matmul %4, %11, %cst_12 {dimension_numbers = #tpu.dot_dimension_numbers<[1], [0], [0], [1], [0, 0, 1, 1], [], []>} : vector<16x32xbf16>, vector<32x32xbf16>, vector<16x32xf32> -> vector<16x32xf32>
    %13 = arith.addf %10, %12 : vector<16x32xf32>
    %c0_13 = arith.constant 0 : index
    %c0_14 = arith.constant 0 : index
    %14 = vector.load %arg14[%c0_13, %c0_14] : memref<16x32xf32, #tpu.memory_space<vmem>>, vector<16x32xf32>
    tpu.vector_store %arg14[%c0_13, %c0_14], %13 {strides = array<i32>} : memref<16x32xf32, #tpu.memory_space<vmem>>, vector<16x32xf32>,
    %c0_15 = arith.constant 0 : index
    %c0_16 = arith.constant 0 : index
    %15 = vector.load %arg15[%c0_15, %c0_16] : memref<16x32xf32, #tpu.memory_space<vmem>>, vector<16x32xf32>
    %c0_17 = arith.constant 0 : index
    %c0_18 = arith.constant 0 : index
    %16 = vector.load %arg6[%c0_17, %c0_18] : memref<32x32xbf16, #tpu.memory_space<vmem>>, vector<32x32xbf16>
    %cst_19 = arith.constant dense<0.000000e+00> : vector<16x32xf32>
    %17 = tpu.matmul %4, %16, %cst_19 {dimension_numbers = #tpu.dot_dimension_numbers<[1], [0], [0], [1], [0, 0, 1, 1], [], []>} : vector<16x32xbf16>, vector<32x32xbf16>, vector<16x32xf32> -> vector<16x32xf32>
    %18 = arith.addf %15, %17 : vector<16x32xf32>
    %c0_20 = arith.constant 0 : index
    %c0_21 = arith.constant 0 : index
    %19 = vector.load %arg15[%c0_20, %c0_21] : memref<16x32xf32, #tpu.memory_space<vmem>>, vector<16x32xf32>
    tpu.vector_store %arg15[%c0_20, %c0_21], %18 {strides = array<i32>} : memref<16x32xf32, #tpu.memory_space<vmem>>, vector<16x32xf32>,
    %c0_i32_22 = arith.constant 0 : i32
    %20 = arith.cmpi eq, %arg2, %c0_i32_22 : i32
    %21 = arith.extui %20 : i1 to i32
    %c0_i32_23 = arith.constant 0 : i32
    %22 = arith.cmpi ne, %21, %c0_i32_23 : i32
    scf.if %22 {
      %c0_24 = arith.constant 0 : index
      %c0_25 = arith.constant 0 : index
      %23 = vector.load %arg13[%c0_24, %c0_25] : memref<16x32xf32, #tpu.memory_space<vmem>>, vector<16x32xf32>
      %c0_26 = arith.constant 0 : index
      %c0_27 = arith.constant 0 : index
      %24 = vector.load %arg7[%c0_26, %c0_27] : memref<1x32xf32, #tpu.memory_space<vmem>>, vector<1x32xf32>
      %25 = vector.broadcast %24 : vector<1x32xf32> to vector<16x32xf32>
      %26 = arith.addf %23, %25 : vector<16x32xf32>
      %27 = arith.truncf %26 : vector<16x32xf32> to vector<16x32xbf16>
      %c0_28 = arith.constant 0 : index
      %c0_29 = arith.constant 0 : index
      %28 = vector.load %arg10[%c0_28, %c0_29] : memref<16x32xbf16, #tpu.memory_space<vmem>>, vector<16x32xbf16>
      tpu.vector_store %arg10[%c0_28, %c0_29], %27 {strides = array<i32>} : memref<16x32xbf16, #tpu.memory_space<vmem>>, vector<16x32xbf16>,
      %c0_30 = arith.constant 0 : index
      %c0_31 = arith.constant 0 : index
      %29 = vector.load %arg14[%c0_30, %c0_31] : memref<16x32xf32, #tpu.memory_space<vmem>>, vector<16x32xf32>
      %c0_32 = arith.constant 0 : index
      %c0_33 = arith.constant 0 : index
      %30 = vector.load %arg8[%c0_32, %c0_33] : memref<1x32xf32, #tpu.memory_space<vmem>>, vector<1x32xf32>
      %31 = vector.broadcast %30 : vector<1x32xf32> to vector<16x32xf32>
      %32 = arith.addf %29, %31 : vector<16x32xf32>
      %33 = arith.truncf %32 : vector<16x32xf32> to vector<16x32xbf16>
      %c0_34 = arith.constant 0 : index
      %c0_35 = arith.constant 0 : index
      %34 = vector.load %arg11[%c0_34, %c0_35] : memref<16x32xbf16, #tpu.memory_space<vmem>>, vector<16x32xbf16>
      tpu.vector_store %arg11[%c0_34, %c0_35], %33 {strides = array<i32>} : memref<16x32xbf16, #tpu.memory_space<vmem>>, vector<16x32xbf16>,
      %c0_36 = arith.constant 0 : index
      %c0_37 = arith.constant 0 : index
      %35 = vector.load %arg15[%c0_36, %c0_37] : memref<16x32xf32, #tpu.memory_space<vmem>>, vector<16x32xf32>
      %c0_38 = arith.constant 0 : index
      %c0_39 = arith.constant 0 : index
      %36 = vector.load %arg9[%c0_38, %c0_39] : memref<1x32xf32, #tpu.memory_space<vmem>>, vector<1x32xf32>
      %37 = vector.broadcast %36 : vector<1x32xf32> to vector<16x32xf32>
      %38 = arith.addf %35, %37 : vector<16x32xf32>
      %39 = arith.truncf %38 : vector<16x32xf32> to vector<16x32xbf16>
      %c0_40 = arith.constant 0 : index
      %c0_41 = arith.constant 0 : index
      %40 = vector.load %arg12[%c0_40, %c0_41] : memref<16x32xbf16, #tpu.memory_space<vmem>>, vector<16x32xbf16>
      tpu.vector_store %arg12[%c0_40, %c0_41], %39 {strides = array<i32>} : memref<16x32xbf16, #tpu.memory_space<vmem>>, vector<16x32xbf16>,
    } else {
    }
    return
  }
  func.func @transform_0(%arg0: i32, %arg1: i32, %arg2: i32) -> (i32, i32) {
    %c0_i32 = arith.constant 0 : i32
    return %arg0, %arg2 : i32, i32
  }
  func.func @transform_1(%arg0: i32, %arg1: i32, %arg2: i32) -> (i32, i32) {
    %c0_i32 = arith.constant 0 : i32
    return %arg2, %arg1 : i32, i32
  }
  func.func @transform_2(%arg0: i32, %arg1: i32, %arg2: i32) -> (i32, i32) {
    %c0_i32 = arith.constant 0 : i32
    return %arg2, %arg1 : i32, i32
  }
  func.func @transform_3(%arg0: i32, %arg1: i32, %arg2: i32) -> (i32, i32) {
    %c0_i32 = arith.constant 0 : i32
    return %arg2, %arg1 : i32, i32
  }
  func.func @transform_4(%arg0: i32, %arg1: i32, %arg2: i32) -> (i32, i32) {
    %c0_i32 = arith.constant 0 : i32
    %c0_i32_0 = arith.constant 0 : i32
    return %c0_i32, %arg1 : i32, i32
  }
  func.func @transform_5(%arg0: i32, %arg1: i32, %arg2: i32) -> (i32, i32) {
    %c0_i32 = arith.constant 0 : i32
    %c0_i32_0 = arith.constant 0 : i32
    return %c0_i32, %arg1 : i32, i32
  }
  func.func @transform_6(%arg0: i32, %arg1: i32, %arg2: i32) -> (i32, i32) {
    %c0_i32 = arith.constant 0 : i32
    %c0_i32_0 = arith.constant 0 : i32
    return %c0_i32, %arg1 : i32, i32
  }
  func.func @transform_7(%arg0: i32, %arg1: i32, %arg2: i32) -> (i32, i32) {
    %c0_i32 = arith.constant 0 : i32
    return %arg0, %arg1 : i32, i32
  }
  func.func @transform_8(%arg0: i32, %arg1: i32, %arg2: i32) -> (i32, i32) {
    %c0_i32 = arith.constant 0 : i32
    return %arg0, %arg1 : i32, i32
  }
  func.func @transform_9(%arg0: i32, %arg1: i32, %arg2: i32) -> (i32, i32) {
    %c0_i32 = arith.constant 0 : i32
    return %arg0, %arg1 : i32, i32
  }
}

</mosaic_0001>

<bundles_post_ra>
// kernel: tpu_custom_call.1
= control target key start
LH: loop header
LB: loop body
LE: loop exit
PB: predicated region body
PF: predicated region fallthrough
CT: control target
= control target key end

     0   :  { %15 = vsyncpa [#allocation6], 0  ;;  %s674_s0 = inlined_call_operand.hbm [shape: f32[16,32], index: 0, kind: input, shape index: {}]   ;;  %s675_s1 = inlined_call_operand.hbm [shape: bf16[32,32], index: 1, kind: input, shape index: {}]   ;;  %s676_s2 = inlined_call_operand.hbm [shape: bf16[32,32], index: 2, kind: input, shape index: {}]   ;;  %s677_s3 = inlined_call_operand.hbm [shape: bf16[32,32], index: 3, kind: input, shape index: {}]   ;;  %s678_s4 = inlined_call_operand.vmem [shape: f32[1,32], index: 4, kind: input, shape index: {}]   ;;  %s679_s5 = inlined_call_operand.vmem [shape: f32[1,32], index: 5, kind: input, shape index: {}]   ;;  %s680_s6 = inlined_call_operand.vmem [shape: f32[1,32], index: 6, kind: input, shape index: {}]   ;;  %s681_s7 = inlined_call_operand.hbm [shape: bf16[16,32], index: 7, kind: output, shape index: {0}]   ;;  %s682_s8 = inlined_call_operand.hbm [shape: bf16[16,32], index: 8, kind: output, shape index: {1}]   ;;  %s683_s9 = inlined_call_operand.hbm [shape: bf16[16,32], index: 9, kind: output, shape index: {2}]  }
   0x1   :  { %16 = vsyncpa [#allocation9], 0 }
   0x2   :  { %17 = vsyncpa [#allocation12], 0 }
   0x3   :  { %18 = vsyncpa [#allocation7], 0  ;;  %s37_s11 = sshll.u32 %s675_s1, 4  ;;  %s38_s11 = int_to_ptr.hbm [resolvable:$true] %s37_s11 }
   0x4   :  { %19 = vsyncpa [#allocation15], 0  ;;  %s543_s12 = smov [#allocation8]   ;;  %s24_s16 = sshll.u32 %s674_s0, 4  ;;  %s25_s16 = int_to_ptr.hbm [resolvable:$true] %s24_s16 }
   0x5   :  { %s39_s13 = sshll.u32 %s543_s12, 4  ;;  %s544_s17 = smov 64   ;;  %s40_s13 = int_to_ptr.vmem [resolvable:$true] %s39_s13 }
   0x6   :  { %s545_s18 = smov 4   ;;  %s546_s19 = smov [#allocation5]  }
   0x7   :  { %45 = dma.hbm_to_vmem [thread:$0]  %s38_s11, 256, %s40_s13, [#allocation9], %s544_s17, %s544_s17, %s545_s18  }
   0x8   :  { %s26_s20 = sshll.u32 %s546_s19, 4  ;;  %s547_s1 = smov 128   ;;  %s27_s20 = int_to_ptr.vmem [resolvable:$true] %s26_s20 }
   0x9   :  { %s548_s21 = smov 8   ;;  %s50_s24 = sshll.u32 %s676_s2, 4  ;;  %s51_s24 = int_to_ptr.hbm [resolvable:$true] %s50_s24 }
   0xa   :  { %32 = dma.hbm_to_vmem [thread:$0]  %s25_s16, 256, %s27_s20, [#allocation6], %s547_s1, %s547_s1, %s548_s21  }
   0xb   :  { %s549_s25 = smov [#allocation10]   ;;  %s63_s28 = sshll.u32 %s677_s3, 4  ;;  %s64_s28 = int_to_ptr.hbm [resolvable:$true] %s63_s28 }
   0xc   :  { %s52_s0 = sshll.u32 %s549_s25, 4  ;;  %s550_s29 = smov [#allocation11]   ;;  %s53_s0 = int_to_ptr.vmem [resolvable:$true] %s52_s0 }
   0xd   :  { %58 = dma.hbm_to_vmem [thread:$0]  %s51_s24, 256, %s53_s0, [#allocation9], %s544_s17, %s544_s17, %s545_s18  }
   0xe   :  { %s65_s30 = sshll.u32 %s550_s29, 4  ;;  %s66_s30 = int_to_ptr.vmem [resolvable:$true] %s65_s30 }
   0xf   :  { %71 = dma.hbm_to_vmem [thread:$0]  %s64_s28, 256, %s66_s30, [#allocation12], %s544_s17, %s544_s17, %s545_s18  }
  0x10   :  { %533 = dma.done.wait [#allocation6], 256  }
  0x11   :  { %534 = vsyncadd [#allocation6], 4294967040 }
  0x12   :  { %535 = dma.done.wait [#allocation9], 512  }
  0x13   :  { %536 = vsyncadd [#allocation9], 4294966784 }
  0x14   :  { %537 = dma.done.wait [#allocation12], 256  }
  0x15   :  { %538 = vsyncadd [#allocation12], 4294967040  ;;  %vm99_vm0 = vcmask 261120   ;;  %v551_v0 = vmov 0.0   ;;  %v345_v1 = vld [vmem:[#allocation8 + $0x8] sm:$0xff]  ;;  %v347_v2 = vld [vmem:[#allocation10 + $0x8] sm:$0xff] }
  0x16   :  { %100 = vst.msk [vmem:[#allocation2] sm:$0xff] %vm99_vm0, %v551_v0  ;;  %v349_v3 = vld [vmem:[#allocation11 + $0x8] sm:$0xff]  ;;  %v344_v4 = vld [vmem:[#allocation8] sm:$0xff]  ;;  %v346_v5 = vld [vmem:[#allocation10] sm:$0xff]  ;;  %137 = vmatpush.bf16.msra.mxu0 %v345_v1  ;;  %173 = vmatpush.bf16.msra.mxu1 %v347_v2  ;;  %vm234_vm1 = vcmask 257024   ;;  %s267_s16 = sshll.u32 %s681_s7, 4  ;;  %s268_s16 = int_to_ptr.hbm [resolvable:$true] %s267_s16 }
  0x17   :  { %101 = vst.msk [vmem:[#allocation2 + $0x8] sm:$0xff] %vm99_vm0, %v551_v0  ;;  %v348_v6 = vld [vmem:[#allocation11] sm:$0xff]  ;;  %v106_v7 = vld [vmem:[#allocation5] sm:$0xff]  ;;  %v107_v8 = vld [vmem:[#allocation5 + $0x8] sm:$0xff]  ;;  %209 = vmatpush.bf16.msra.mxu2 %v349_v3  ;;  %s553_s19 = smov [#allocation14]   ;;  %s280_s21 = sshll.u32 %s682_s8, 4  ;;  %s281_s21 = int_to_ptr.hbm [resolvable:$true] %s280_s21 }
  0x18   :  { %102 = vst.msk [vmem:[#allocation3] sm:$0xff] %vm99_vm0, %v551_v0  ;;  %v108_v9 = vpack.c.bf16 %v107_v8, %v106_v7  ;;  %v363_v20 = vld [vmem:[%s678_s4] ss:$0 sm:$0xff]  ;;  %s554_s7 = smov [#allocation16]   ;;  %s293_s25 = sshll.u32 %s683_s9, 4  ;;  %s294_s25 = int_to_ptr.hbm [resolvable:$true] %s293_s25 }
  0x19   :  { %103 = vst.msk [vmem:[#allocation3 + $0x8] sm:$0xff] %vm99_vm0, %v551_v0  ;;  %v362_v24 = vld [vmem:[%s679_s5] ss:$0 sm:$0xff]  ;;  %s552_s5 = smov [#allocation13]   ;;  %s291_s22 = sshll.u32 %s554_s7, 4  ;;  %s292_s22 = int_to_ptr.vmem [resolvable:$true] %s291_s22 }
  0x1a   :  { %104 = vst.msk [vmem:[#allocation4] sm:$0xff] %vm99_vm0, %v551_v0  ;;  %138 = vmatpush.bf16.msra.mxu0 %v344_v4  ;;  %174 = vmatpush.bf16.msra.mxu1 %v346_v5  ;;  %v364_v34 = vld [vmem:[%s680_s6] ss:$0 sm:$0xff]  ;;  %s265_s13 = sshll.u32 %s552_s5, 4  ;;  %s278_s6 = sshll.u32 %s553_s19, 4  ;;  %s266_s13 = int_to_ptr.vmem [resolvable:$true] %s265_s13  ;;  %s279_s6 = int_to_ptr.vmem [resolvable:$true] %s278_s6 }
  0x1b   :  { %105 = vst.msk [vmem:[#allocation4 + $0x8] sm:$0xff] %vm99_vm0, %v551_v0  ;;  %210 = vmatpush.bf16.msra.mxu2 %v348_v6 }
  0x1d   :  { %325 = vmatmul.msk.bf16.vlgmr.msra.gmra.mxu0 %vm99_vm0, %v108_v9  ;;  %334 = vmatmul.msk.bf16.vlgmr.msra.gmra.mxu1 %vm99_vm0, %v108_v9  ;;  %v109_v10 = vld [vmem:[#allocation2] sm:$0xff] }
  0x1e   :  { %343 = vmatmul.msk.bf16.vlgmr.msra.gmra.mxu2 %vm99_vm0, %v108_v9  ;;  %v110_v17 = vld [vmem:[#allocation2 + $0x8] sm:$0xff] }
  0x1f   :  { %v149_v11 = vld [vmem:[#allocation3] sm:$0xff] }
  0x20   :  { %v150_v18 = vld [vmem:[#allocation3 + $0x8] sm:$0xff] }
  0x21   :  { %v185_v16 = vld [vmem:[#allocation4] sm:$0xff] }
  0x22   :  { %v186_v31 = vld [vmem:[#allocation4 + $0x8] sm:$0xff] }
  0x9a   :  { %v140_v12 = vpop.f32.mrf.mxu0  ;;  %v176_v13 = vpop.f32.mrf.mxu1 }
  0x9b   :  { %v145_v14 = vadd.f32 %v140_v12, %v109_v10  ;;  %v181_v15 = vadd.f32 %v176_v13, %v149_v11 }
  0x9d   :  { %147 = vst.msk [vmem:[#allocation2] sm:$0xff] %vm99_vm0, %v145_v14 }
  0x9e   :  { %183 = vst.msk [vmem:[#allocation3] sm:$0xff] %vm99_vm0, %v181_v15 }
  0xa1   :  { %v212_v19 = vpop.f32.mrf.mxu2 }
  0xa2   :  { %v217_v21 = vadd.f32 %v212_v19, %v185_v16  ;;  %v142_v22 = vpop.f32.mrf.mxu0  ;;  %v178_v23 = vpop.f32.mrf.mxu1 }
  0xa3   :  { %v146_v25 = vadd.f32 %v142_v22, %v110_v17  ;;  %v182_v26 = vadd.f32 %v178_v23, %v150_v18 }
  0xa4   :  { %219 = vst.msk [vmem:[#allocation4] sm:$0xff] %vm99_vm0, %v217_v21  ;;  %v224_v27 = vld [vmem:[#allocation2] sm:$0xff] }
  0xa5   :  { %148 = vst.msk [vmem:[#allocation2 + $0x8] sm:$0xff] %vm99_vm0, %v146_v25  ;;  %v237_v28 = vld [vmem:[#allocation3] sm:$0xff]  ;;  %v230_v29 = vadd.f32 %v363_v20, %v224_v27 }
  0xa6   :  { %184 = vst.msk [vmem:[#allocation3 + $0x8] sm:$0xff] %vm99_vm0, %v182_v26  ;;  %v243_v30 = vadd.f32 %v362_v24, %v237_v28 }
  0xa7   :  { %v232_v32 = vpack.c.bf16 %v230_v29, %v230_v29 }
  0xa8   :  { %v245_v33 = vpack.c.bf16 %v243_v30, %v243_v30 }
  0xa9   :  { %v214_v35 = vpop.f32.mrf.mxu2  ;;  %235 = vst.msk [vmem:[#allocation13] sm:$0xf] %vm234_vm1, %v232_v32 }
  0xaa   :  { %v218_v36 = vadd.f32 %v214_v35, %v186_v31  ;;  %247 = vst.msk [vmem:[#allocation14] sm:$0xf] %vm234_vm1, %v245_v33 }
  0xab   :  { %v249_v37 = vld [vmem:[#allocation4] sm:$0xff] }
  0xac   :  { %220 = vst.msk [vmem:[#allocation4 + $0x8] sm:$0xff] %vm99_vm0, %v218_v36  ;;  %v225_v38 = vld [vmem:[#allocation2 + $0x8] sm:$0xff]  ;;  %v255_v39 = vadd.f32 %v364_v34, %v249_v37 }
  0xad   :  { %v238_v40 = vld [vmem:[#allocation3 + $0x8] sm:$0xff]  ;;  %v231_v41 = vadd.f32 %v363_v20, %v225_v38 }
  0xae   :  { %v244_v42 = vadd.f32 %v362_v24, %v238_v40  ;;  %v257_v43 = vpack.c.bf16 %v255_v39, %v255_v39 }
  0xaf   :  { %v233_v44 = vpack.c.bf16 %v231_v41, %v231_v41 }
  0xb0   :  { %v246_v45 = vpack.c.bf16 %v244_v42, %v244_v42  ;;  %259 = vst.msk [vmem:[#allocation16] sm:$0xf] %vm234_vm1, %v257_v43 }
  0xb1   :  { %236 = vst.msk [vmem:[#allocation13 + $0x4] sm:$0xf] %vm234_vm1, %v233_v44 }
  0xb2   :  { %248 = vst.msk [vmem:[#allocation14 + $0x4] sm:$0xf] %vm234_vm1, %v246_v45  ;;  %273 = dma.vmem_to_hbm [thread:$0]  %s266_s13, 128, %s268_s16, [#allocation7], %s544_s17, %s544_s17, %s545_s18  }
  0xb3   :  { %286 = dma.vmem_to_hbm [thread:$0]  %s279_s6, 128, %s281_s21, [#allocation15], %s544_s17, %s544_s17, %s545_s18   ;;  %v250_v46 = vld [vmem:[#allocation4 + $0x8] sm:$0xff] }
  0xb4   :  { %v256_v47 = vadd.f32 %v364_v34, %v250_v46 }
  0xb6   :  { %v258_v48 = vpack.c.bf16 %v256_v47, %v256_v47 }
  0xb8   :  { %260 = vst.msk [vmem:[#allocation16 + $0x4] sm:$0xf] %vm234_vm1, %v258_v48 }
  0xb9   :  { %299 = dma.vmem_to_hbm [thread:$0]  %s292_s22, 128, %s294_s25, [#allocation15], %s544_s17, %s544_s17, %s545_s18  }
  0xba   :  { %539 = dma.done.wait [#allocation7], 128  }
  0xbb   :  { %540 = vsyncadd [#allocation7], 4294967168 }
  0xbc   :  { %541 = dma.done.wait [#allocation15], 256  }
  0xbd   :  { %542 = vsyncadd [#allocation15], 4294967040 }
  0xbe   :  { %312 = vsyncpa [#allocation6], 1 }
  0xbf   :  { %313 = vsyncpa [#allocation9], 1 }
  0xc0   :  { %314 = vsyncpa [#allocation12], 1 }
  0xc1   :  { %315 = vsyncpa [#allocation7], 1 }
  0xc2   :  { %316 = vsyncpa [#allocation15], 1 }

</bundles_post_ra>
